<compile_context>
chip_gen: v6e
topology: v6e:2x2x1
jax: 0.10.0
libtpu: 0.0.40
codegen_flags: <defaults>
</compile_context>

<pallas_src>
import functools
import math

import jax
import jax.numpy as jnp
import numpy as np
from jax.experimental import pallas as pl
from jax.experimental.pallas import tpu as pltpu

LANE = 128  # lane width: pad every feature dim to a multiple of this


def _round_up(x, m):
    return (x + m - 1) // m * m


def _pad2(a, rows, cols):
    return jnp.pad(a, ((0, rows - a.shape[0]), (0, cols - a.shape[1])))


def _bn_fold(bn, eps=1e-5):
    """Fold eval-mode BatchNorm1d into per-feature (scale, shift)."""
    inv_std = 1.0 / jnp.sqrt(bn["var"] + eps)
    scale = bn["gamma"] * inv_std
    shift = bn["beta"] - bn["mean"] * scale
    return scale, shift


# -----------------------------------------------------------------------------
# Fused MLP kernel: the entire network (hidden layers + output) per batch tile.
# refs = [x, (w, b, shift) * num_hidden, w_out, b_out, o]
# -----------------------------------------------------------------------------
def _fused_mlp_kernel(*refs, num_hidden):
    x_ref, o_ref = refs[0], refs[-1]
    params = refs[1:-1]

    x = x_ref[...]                                   # bf16 [tile_b, Din_pad]
    k = 0
    for _ in range(num_hidden):
        w, b, s = params[k][...], params[k + 1][...], params[k + 2][...]
        k += 3
        z = jnp.dot(x, w, preferred_element_type=jnp.float32) + b   # MXU, f32 acc
        x = (jnp.maximum(z, 0.0) + s).astype(w.dtype)               # ReLU + BN shift
    w, b = params[k][...], params[k + 1][...]
    out = jnp.dot(x, w, preferred_element_type=jnp.float32) + b     # output layer
    o_ref[...] = out.astype(o_ref.dtype)             # lane-dense full-width store


def fused_mlp(x_pad, prepped, tile_b):
    """x_pad: [B_pad, Din_pad] (compute dtype). Returns [B_pad, Dout_pad] f32."""
    b_pad, din_pad = x_pad.shape
    out_pad = prepped["out_pad"]
    nh = prepped["num_hidden"]
    assert b_pad % tile_b == 0
    grid = (b_pad // tile_b,)

    in_specs = [pl.BlockSpec((tile_b, din_pad), lambda i: (i, 0))]
    inputs = [x_pad]
    for li in range(nh):
        w = prepped["weights"][li]
        b = prepped["biases"][li]
        s = prepped["shifts"][li]
        in_specs += [pl.BlockSpec(w.shape, lambda i: (0, 0)),   # VMEM-resident
                     pl.BlockSpec(b.shape, lambda i: (0, 0)),
                     pl.BlockSpec(s.shape, lambda i: (0, 0))]
        inputs += [w, b, s]
    w_o = prepped["weights"][nh]
    b_o = prepped["biases"][nh]
    in_specs += [pl.BlockSpec(w_o.shape, lambda i: (0, 0)),
                 pl.BlockSpec(b_o.shape, lambda i: (0, 0))]
    inputs += [w_o, b_o]

    return pl.pallas_call(
        functools.partial(_fused_mlp_kernel, num_hidden=nh),
        out_shape=jax.ShapeDtypeStruct((b_pad, out_pad), jnp.float32),
        grid_spec=pltpu.PrefetchScalarGridSpec(
            num_scalar_prefetch=0,
            grid=grid,
            in_specs=in_specs,
            out_specs=pl.BlockSpec((tile_b, out_pad), lambda i: (i, 0)),
        ),
        compiler_params=pltpu.CompilerParams(
            dimension_semantics=("parallel",)),   # batch tiles shard across TCs
    )(*inputs)


# -----------------------------------------------------------------------------
# Parameter construction (mirrors the module's __init__) and one-time prep.
# -----------------------------------------------------------------------------
def init_params(key, emb_dims, num_continuous, lin_layer_sizes, output_size):
    params = {}
    n_keys = len(emb_dims) + 2 * len(lin_layer_sizes) + 2
    keys = jax.random.split(key, n_keys)
    ki = iter(keys)

    # Embedding tables: torch.nn.Embedding default init ~ N(0, 1)
    params["emb_tables"] = [
        jax.random.normal(next(ki), (n, d), jnp.float32) for n, d in emb_dims
    ]
    num_embeds = sum(d for _, d in emb_dims)

    # Linear layers (kaiming_normal_ weights, default uniform bias)
    layer_dims = [num_embeds + num_continuous] + list(lin_layer_sizes)
    lin = []
    for i in range(len(lin_layer_sizes)):
        fan_in, fan_out = layer_dims[i], layer_dims[i + 1]
        w = jax.random.normal(next(ki), (fan_out, fan_in), jnp.float32) * math.sqrt(2.0 / fan_in)
        bound = 1.0 / math.sqrt(fan_in)
        b = jax.random.uniform(next(ki), (fan_out,), jnp.float32, -bound, bound)
        lin.append((w, b))
    params["lin_layers"] = lin

    fan_in = lin_layer_sizes[-1]
    w_out = jax.random.normal(next(ki), (output_size, fan_in), jnp.float32) * math.sqrt(2.0 / fan_in)
    bound = 1.0 / math.sqrt(fan_in)
    b_out = jax.random.uniform(next(ki), (output_size,), jnp.float32, -bound, bound)
    params["output_layer"] = (w_out, b_out)

    # BatchNorm1d params (fresh init): gamma=1, beta=0, running_mean=0, running_var=1
    def bn_init(n):
        return dict(gamma=jnp.ones((n,), jnp.float32),
                    beta=jnp.zeros((n,), jnp.float32),
                    mean=jnp.zeros((n,), jnp.float32),
                    var=jnp.ones((n,), jnp.float32))
    params["first_bn"] = bn_init(num_continuous)
    params["bns"] = [bn_init(s) for s in lin_layer_sizes]
    return params


def prepare_params(raw, emb_dims, num_continuous, lin_layer_sizes, output_size,
                   compute_dtype=jnp.bfloat16):
    """Fold BN into the linears, transpose, pad to lane multiples, cast. Done once."""
    num_embeds = sum(d for _, d in emb_dims)
    din = num_embeds + num_continuous
    scale_c, shift_c = _bn_fold(raw["first_bn"])

    weights, biases, shifts = [], [], []
    for i, ((w, b), bn) in enumerate(zip(raw["lin_layers"], raw["bns"])):
        w_t = jnp.transpose(w)                      # [in, out]
        if i == 0 and num_continuous > 0:
            # fold eval-mode BN of continuous features into the first linear
            w_cont = w_t[num_embeds:, :]
            b = b + shift_c @ w_cont
            w_t = jnp.concatenate([w_t[:num_embeds, :],
                                   w_cont * scale_c[:, None]], axis=0)
        s, t = _bn_fold(bn)
        # relu(z)*s == relu(z*s) only for s >= 0 (gamma >= 0); fresh init -> s > 0.
        assert bool(jnp.all(s >= 0)), "BN scale must be >= 0 to fold pre-ReLU"
        weights.append(w_t * s[None, :])
        biases.append(b * s)
        shifts.append(t)

    w_out, b_out = raw["output_layer"]
    weights.append(jnp.transpose(w_out))
    biases.append(b_out)

    dims = [din] + list(lin_layer_sizes) + [output_size]
    pdims = [_round_up(d, LANE) for d in dims]

    p_w, p_b, p_s = [], [], []
    for i, w_t in enumerate(weights):
        p_w.append(_pad2(w_t, pdims[i], pdims[i + 1]).astype(compute_dtype))
        p_b.append(_pad2(biases[i].reshape(1, -1), 1, pdims[i + 1]).astype(jnp.float32))
        if i < len(shifts):
            p_s.append(_pad2(shifts[i].reshape(1, -1), 1, pdims[i + 1]).astype(jnp.float32))

    return dict(emb_tables=raw["emb_tables"], weights=p_w, biases=p_b, shifts=p_s,
                din=din, din_pad=pdims[0], out_dim=output_size, out_pad=pdims[-1],
                num_hidden=len(lin_layer_sizes), compute_dtype=compute_dtype)


# -----------------------------------------------------------------------------
# Forward pass: embedding gather / concat / pad in JAX, fused MLP in Pallas.
# -----------------------------------------------------------------------------
def feed_forward_net(prepped, cont_data, cat_data, tile_b=128):
    B = cont_data.shape[0]
    embs = [tbl[cat_data[:, i]] for i, tbl in enumerate(prepped["emb_tables"])]
    # raw continuous features: their BN is already folded into the first linear
    x = jnp.concatenate(embs + [cont_data], axis=1)         # [B, din]
    b_pad = max(tile_b, _round_up(B, tile_b))
    x = jnp.pad(x, ((0, b_pad - B), (0, prepped["din_pad"] - prepped["din"]))
                ).astype(prepped["compute_dtype"])
    out = fused_mlp(x, prepped, tile_b)
    return out[:B, :prepped["out_dim"]]


# Pure-JAX replica of the exact fused math (same folded/padded/cast params).
def feed_forward_net_ref_prepped(prepped, cont_data, cat_data):
    embs = [tbl[cat_data[:, i]] for i, tbl in enumerate(prepped["emb_tables"])]
    x = jnp.concatenate(embs + [cont_data], axis=1)
    x = jnp.pad(x, ((0, 0), (0, prepped["din_pad"] - prepped["din"]))
                ).astype(prepped["compute_dtype"])
    nh = prepped["num_hidden"]
    for li in range(nh):
        z = jnp.dot(x, prepped["weights"][li],
                    preferred_element_type=jnp.float32) + prepped["biases"][li]
        x = (jnp.maximum(z, 0.0) + prepped["shifts"][li]).astype(prepped["compute_dtype"])
    out = jnp.dot(x, prepped["weights"][nh],
                  preferred_element_type=jnp.float32) + prepped["biases"][nh]
    return out[:, :prepped["out_dim"]]


# Pure-JAX f32 reference of the module's eval-mode semantics (no folding).
def feed_forward_net_ref_f32(raw, cont_data, cat_data):
    embs = [tbl[cat_data[:, i]] for i, tbl in enumerate(raw["emb_tables"])]
    x = jnp.concatenate(embs, axis=1)
    sc, tc = _bn_fold(raw["first_bn"])
    x = jnp.concatenate([x, cont_data * sc + tc], axis=1)
    for (w, b), bn in zip(raw["lin_layers"], raw["bns"]):
        x = jax.nn.relu(x @ w.T + b)
        s, t = _bn_fold(bn)
        x = x * s + t
    w_out, b_out = raw["output_layer"]
    return x @ w_out.T + b_out


# -----------------------------------------------------------------------------
if __name__ == "__main__":
    # Module configuration.
    emb_dims = [(10, 4), (8, 3), (6, 5)]      # num_embeds = 12
    num_continuous = 4
    lin_layer_sizes = [32, 16]
    output_size = 2
    # batch = 256 -> two 128-row batch tiles (keeps both v7x TensorCores busy).
    batch = 256

    key = jax.random.PRNGKey(0)
    k_params, k_cont, k_cat = jax.random.split(key, 3)

    raw = init_params(k_params, emb_dims, num_continuous, lin_layer_sizes, output_size)
    prepped = prepare_params(raw, emb_dims, num_continuous, lin_layer_sizes,
                             output_size, compute_dtype=jnp.bfloat16)

    cont_data = jax.random.normal(k_cont, (batch, num_continuous), jnp.float32)
    cat_keys = jax.random.split(k_cat, len(emb_dims))
    cat_data = jnp.stack(
        [jax.random.randint(cat_keys[i], (batch,), 0, n, jnp.int32)
         for i, (n, _) in enumerate(emb_dims)], axis=1)

    fwd = jax.jit(lambda c, k: feed_forward_net(prepped, c, k))
    out = jax.block_until_ready(fwd(cont_data, cat_data))
    assert out.shape == (batch, output_size)

    # 1) Kernel vs pure-JAX replica of the identical bf16 fused math.
    ref_bf16 = feed_forward_net_ref_prepped(prepped, cont_data, cat_data)
    np.testing.assert_allclose(np.asarray(out), np.asarray(ref_bf16),
                               rtol=2e-3, atol=2e-3)

    # 2) BN-folding correctness in f32 against the module's eval-mode math.
    prepped_f32 = prepare_params(raw, emb_dims, num_continuous, lin_layer_sizes,
                                 output_size, compute_dtype=jnp.float32)
    with jax.default_matmul_precision("highest"):
        folded_f32 = feed_forward_net_ref_prepped(prepped_f32, cont_data, cat_data)
        semantic_f32 = feed_forward_net_ref_f32(raw, cont_data, cat_data)
    np.testing.assert_allclose(np.asarray(folded_f32), np.asarray(semantic_f32),
                               rtol=1e-4, atol=1e-4)

    # 3) Non-multiple-of-tile batch exercises the batch-padding path.
    out_small = jax.block_until_ready(
        feed_forward_net(prepped, cont_data[:5], cat_data[:5]))
    np.testing.assert_allclose(np.asarray(out_small), np.asarray(out[:5]),
                               rtol=2e-3, atol=2e-3)

    print("KERNEL_OK")
</pallas_src>

<mosaic_0001>
module attributes {stable_mosaic.version = 11 : i64} {
  func.func @_fused_mlp_kernel(%arg0: i32, %arg1: memref<128x128xbf16, #tpu.memory_space<vmem>>, %arg2: memref<128x128xbf16, #tpu.memory_space<vmem>>, %arg3: memref<1x128xf32, #tpu.memory_space<vmem>>, %arg4: memref<1x128xf32, #tpu.memory_space<vmem>>, %arg5: memref<128x128xbf16, #tpu.memory_space<vmem>>, %arg6: memref<1x128xf32, #tpu.memory_space<vmem>>, %arg7: memref<1x128xf32, #tpu.memory_space<vmem>>, %arg8: memref<128x128xbf16, #tpu.memory_space<vmem>>, %arg9: memref<1x128xf32, #tpu.memory_space<vmem>>, %arg10: memref<128x128xf32, #tpu.memory_space<vmem>>) attributes {dimension_semantics = [#tpu.dimension_semantics<parallel>], iteration_bounds = array<i64: 2>, scalar_prefetch = 0 : i64, scratch_operands = 0 : i64, tpu.core_type = #tpu.core_type<tc>, window_params = [{transform_indices = @transform_0, window_bounds = array<i64: 128, 128>}, {pipeline_mode = #tpu.pipeline_mode<synchronous>, transform_indices = @transform_1, window_bounds = array<i64: 128, 128>}, {pipeline_mode = #tpu.pipeline_mode<synchronous>, transform_indices = @transform_2, window_bounds = array<i64: 1, 128>}, {pipeline_mode = #tpu.pipeline_mode<synchronous>, transform_indices = @transform_3, window_bounds = array<i64: 1, 128>}, {pipeline_mode = #tpu.pipeline_mode<synchronous>, transform_indices = @transform_4, window_bounds = array<i64: 128, 128>}, {pipeline_mode = #tpu.pipeline_mode<synchronous>, transform_indices = @transform_5, window_bounds = array<i64: 1, 128>}, {pipeline_mode = #tpu.pipeline_mode<synchronous>, transform_indices = @transform_6, window_bounds = array<i64: 1, 128>}, {pipeline_mode = #tpu.pipeline_mode<synchronous>, transform_indices = @transform_7, window_bounds = array<i64: 128, 128>}, {pipeline_mode = #tpu.pipeline_mode<synchronous>, transform_indices = @transform_8, window_bounds = array<i64: 1, 128>}, {transform_indices = @transform_9, window_bounds = array<i64: 128, 128>}]} {
    %c0 = arith.constant 0 : index
    %c0_0 = arith.constant 0 : index
    %0 = vector.load %arg1[%c0, %c0_0] : memref<128x128xbf16, #tpu.memory_space<vmem>>, vector<128x128xbf16>
    %c0_1 = arith.constant 0 : index
    %c0_2 = arith.constant 0 : index
    %1 = vector.load %arg2[%c0_1, %c0_2] : memref<128x128xbf16, #tpu.memory_space<vmem>>, vector<128x128xbf16>
    %c0_3 = arith.constant 0 : index
    %c0_4 = arith.constant 0 : index
    %2 = vector.load %arg3[%c0_3, %c0_4] : memref<1x128xf32, #tpu.memory_space<vmem>>, vector<1x128xf32>
    %c0_5 = arith.constant 0 : index
    %c0_6 = arith.constant 0 : index
    %3 = vector.load %arg4[%c0_5, %c0_6] : memref<1x128xf32, #tpu.memory_space<vmem>>, vector<1x128xf32>
    %cst = arith.constant dense<0.000000e+00> : vector<128x128xf32>
    %4 = tpu.matmul %0, %1, %cst {dimension_numbers = #tpu.dot_dimension_numbers<[1], [0], [0], [1], [0, 0, 1, 1], [], []>} : vector<128x128xbf16>, vector<128x128xbf16>, vector<128x128xf32> -> vector<128x128xf32>
    %5 = vector.broadcast %2 : vector<1x128xf32> to vector<128x128xf32>
    %6 = arith.addf %4, %5 : vector<128x128xf32>
    %cst_7 = arith.constant 0.000000e+00 : f32
    %7 = vector.broadcast %cst_7 : f32 to vector<128x128xf32>
    %8 = arith.maximumf %6, %7 : vector<128x128xf32>
    %9 = vector.broadcast %3 : vector<1x128xf32> to vector<128x128xf32>
    %10 = arith.addf %8, %9 : vector<128x128xf32>
    %11 = arith.truncf %10 : vector<128x128xf32> to vector<128x128xbf16>
    %c0_8 = arith.constant 0 : index
    %c0_9 = arith.constant 0 : index
    %12 = vector.load %arg5[%c0_8, %c0_9] : memref<128x128xbf16, #tpu.memory_space<vmem>>, vector<128x128xbf16>
    %c0_10 = arith.constant 0 : index
    %c0_11 = arith.constant 0 : index
    %13 = vector.load %arg6[%c0_10, %c0_11] : memref<1x128xf32, #tpu.memory_space<vmem>>, vector<1x128xf32>
    %c0_12 = arith.constant 0 : index
    %c0_13 = arith.constant 0 : index
    %14 = vector.load %arg7[%c0_12, %c0_13] : memref<1x128xf32, #tpu.memory_space<vmem>>, vector<1x128xf32>
    %cst_14 = arith.constant dense<0.000000e+00> : vector<128x128xf32>
    %15 = tpu.matmul %11, %12, %cst_14 {dimension_numbers = #tpu.dot_dimension_numbers<[1], [0], [0], [1], [0, 0, 1, 1], [], []>} : vector<128x128xbf16>, vector<128x128xbf16>, vector<128x128xf32> -> vector<128x128xf32>
    %16 = vector.broadcast %13 : vector<1x128xf32> to vector<128x128xf32>
    %17 = arith.addf %15, %16 : vector<128x128xf32>
    %cst_15 = arith.constant 0.000000e+00 : f32
    %18 = vector.broadcast %cst_15 : f32 to vector<128x128xf32>
    %19 = arith.maximumf %17, %18 : vector<128x128xf32>
    %20 = vector.broadcast %14 : vector<1x128xf32> to vector<128x128xf32>
    %21 = arith.addf %19, %20 : vector<128x128xf32>
    %22 = arith.truncf %21 : vector<128x128xf32> to vector<128x128xbf16>
    %c0_16 = arith.constant 0 : index
    %c0_17 = arith.constant 0 : index
    %23 = vector.load %arg8[%c0_16, %c0_17] : memref<128x128xbf16, #tpu.memory_space<vmem>>, vector<128x128xbf16>
    %c0_18 = arith.constant 0 : index
    %c0_19 = arith.constant 0 : index
    %24 = vector.load %arg9[%c0_18, %c0_19] : memref<1x128xf32, #tpu.memory_space<vmem>>, vector<1x128xf32>
    %cst_20 = arith.constant dense<0.000000e+00> : vector<128x128xf32>
    %25 = tpu.matmul %22, %23, %cst_20 {dimension_numbers = #tpu.dot_dimension_numbers<[1], [0], [0], [1], [0, 0, 1, 1], [], []>} : vector<128x128xbf16>, vector<128x128xbf16>, vector<128x128xf32> -> vector<128x128xf32>
    %26 = vector.broadcast %24 : vector<1x128xf32> to vector<128x128xf32>
    %27 = arith.addf %25, %26 : vector<128x128xf32>
    %c0_21 = arith.constant 0 : index
    %c0_22 = arith.constant 0 : index
    %28 = vector.load %arg10[%c0_21, %c0_22] : memref<128x128xf32, #tpu.memory_space<vmem>>, vector<128x128xf32>
    tpu.vector_store %arg10[%c0_21, %c0_22], %27 {strides = array<i32>} : memref<128x128xf32, #tpu.memory_space<vmem>>, vector<128x128xf32>,
    return
  }
  func.func @transform_0(%arg0: i32) -> (i32, i32) {
    %c0_i32 = arith.constant 0 : i32
    %c0_i32_0 = arith.constant 0 : i32
    return %arg0, %c0_i32 : i32, i32
  }
  func.func @transform_1(%arg0: i32) -> (i32, i32) {
    %c0_i32 = arith.constant 0 : i32
    %c0_i32_0 = arith.constant 0 : i32
    %c0_i32_1 = arith.constant 0 : i32
    return %c0_i32, %c0_i32_0 : i32, i32
  }
  func.func @transform_2(%arg0: i32) -> (i32, i32) {
    %c0_i32 = arith.constant 0 : i32
    %c0_i32_0 = arith.constant 0 : i32
    %c0_i32_1 = arith.constant 0 : i32
    return %c0_i32, %c0_i32_0 : i32, i32
  }
  func.func @transform_3(%arg0: i32) -> (i32, i32) {
    %c0_i32 = arith.constant 0 : i32
    %c0_i32_0 = arith.constant 0 : i32
    %c0_i32_1 = arith.constant 0 : i32
    return %c0_i32, %c0_i32_0 : i32, i32
  }
  func.func @transform_4(%arg0: i32) -> (i32, i32) {
    %c0_i32 = arith.constant 0 : i32
    %c0_i32_0 = arith.constant 0 : i32
    %c0_i32_1 = arith.constant 0 : i32
    return %c0_i32, %c0_i32_0 : i32, i32
  }
  func.func @transform_5(%arg0: i32) -> (i32, i32) {
    %c0_i32 = arith.constant 0 : i32
    %c0_i32_0 = arith.constant 0 : i32
    %c0_i32_1 = arith.constant 0 : i32
    return %c0_i32, %c0_i32_0 : i32, i32
  }
  func.func @transform_6(%arg0: i32) -> (i32, i32) {
    %c0_i32 = arith.constant 0 : i32
    %c0_i32_0 = arith.constant 0 : i32
    %c0_i32_1 = arith.constant 0 : i32
    return %c0_i32, %c0_i32_0 : i32, i32
  }
  func.func @transform_7(%arg0: i32) -> (i32, i32) {
    %c0_i32 = arith.constant 0 : i32
    %c0_i32_0 = arith.constant 0 : i32
    %c0_i32_1 = arith.constant 0 : i32
    return %c0_i32, %c0_i32_0 : i32, i32
  }
  func.func @transform_8(%arg0: i32) -> (i32, i32) {
    %c0_i32 = arith.constant 0 : i32
    %c0_i32_0 = arith.constant 0 : i32
    %c0_i32_1 = arith.constant 0 : i32
    return %c0_i32, %c0_i32_0 : i32, i32
  }
  func.func @transform_9(%arg0: i32) -> (i32, i32) {
    %c0_i32 = arith.constant 0 : i32
    %c0_i32_0 = arith.constant 0 : i32
    return %arg0, %c0_i32 : i32, i32
  }
}

</mosaic_0001>

<bundles_post_ra>
// kernel: _lambda_.1
= control target key start
LH: loop header
LB: loop body
LE: loop exit
PB: predicated region body
PF: predicated region fallthrough
CT: control target
= control target key end

     0   :  { %s1377_s30 = smov 0   ;;  %s1597_s0 = inlined_call_operand.vmem [shape: bf16[256,128], index: 0, kind: input, shape index: {}]   ;;  %s1598_s1 = inlined_call_operand.vmem [shape: bf16[128,128], index: 1, kind: input, shape index: {}]   ;;  %s1599_s2 = inlined_call_operand.vmem [shape: f32[1,128], index: 2, kind: input, shape index: {}]   ;;  %s1600_s3 = inlined_call_operand.vmem [shape: f32[1,128], index: 3, kind: input, shape index: {}, may-alias: {3,6}]   ;;  %s1601_s4 = inlined_call_operand.vmem [shape: bf16[128,128], index: 4, kind: input, shape index: {}]   ;;  %s1602_s5 = inlined_call_operand.vmem [shape: f32[1,128], index: 5, kind: input, shape index: {}]   ;;  %s1603_s6 = inlined_call_operand.vmem [shape: f32[1,128], index: 6, kind: input, shape index: {}, may-alias: {3,6}]   ;;  %s1604_s7 = inlined_call_operand.vmem [shape: bf16[128,128], index: 7, kind: input, shape index: {}]   ;;  %s1605_s8 = inlined_call_operand.vmem [shape: f32[1,128], index: 8, kind: input, shape index: {}]   ;;  %s1606_s9 = inlined_call_operand.vmem [shape: f32[256,128], index: 9, kind: output, shape index: {}]  }
   0x1 LB: > { %s1071_s10 = sadd.s32 4294967295, %s1325_s30   ;;  %p1075_p0 = scmp.ge.s32.totalorder %s1325_s30, 1  ;;  %s1325_s30 = sphi %s1377_s30, %s19_s30  }
   0x2   : > { %p288_p1 = scmp.lt.s32.totalorder %s1325_s30, 3 }
   0x4   : > { %p289_p2 = pnand %p1075_p0, %p288_p1 }
   0x5   : > { %s1076_s13 = sshll.u32 (!%p289_p2), %s1071_s10, 4 }
   0x6   : > { %292 = sbr.rel (%p289_p2) target bundleno = 686 (0x2ae), region = 56  ;;  %p325_p3 = scmp.lt.s32.totalorder (!%p289_p2), %s1076_s13, 31 }
   0xb   : > { %v1287_v0 = vld [vmem:[%s1598_s1 + $0x38] sm:$0xff]   ;;  %v1288_v1 = vld [vmem:[%s1598_s1 + $0x30] sm:$0xff]   ;;  %s1608_s13 = smov (!%p325_p3, %s1076_s13), 31  ;;  %v1289_v2 = vld [vmem:[%s1598_s1 + $0x28] sm:$0xff]  }
   0xc   : > { %1167 = vmatprep.subr.bf16.mxu0 %v1287_v0  ;;  %s1077_s18 = sshll.u32 %s1608_s13, 2  ;;  %v1290_v3 = vld [vmem:[%s1598_s1 + $0x20] sm:$0xff]   ;;  %v1291_v5 = vld [vmem:[%s1598_s1 + $0x18] sm:$0xff]   ;;  %v1292_v6 = vld [vmem:[%s1598_s1 + $0x10] sm:$0xff]   ;;  %s1079_s15 = sshll.u32 %s1608_s13, 3 }
   0xd   : > { %1168 = vmatpush3.bf16.msra.mxu0 %v1287_v0  ;;  %s1400_s21 = scalar_lea.vmem %s1597_s0, %s1077_s18  ;;  %v1303_v7 = vld [vmem:[%s1601_s4 + $0x38] sm:$0xff]   ;;  %v1304_v8 = vld [vmem:[%s1601_s4 + $0x30] sm:$0xff]   ;;  %v1293_v9 = vld [vmem:[%s1598_s1 + $0x8] sm:$0xff]   ;;  %s1576_s20 = scalar_lea.vmem %s1606_s9, %s1079_s15 }
   0xe   : > { %1169 = vmatprep.subr.bf16.mxu0 %v1288_v1  ;;  %v1295_v4 = vld [vmem:[%s1400_s21] sm:$0xff]   ;;  %1199 = vmatprep.subr.bf16.mxu1 %v1303_v7  ;;  %v1305_v10 = vld [vmem:[%s1601_s4 + $0x28] sm:$0xff]   ;;  %v1297_v14 = vld [vmem:[%s1400_s21 + $0x10] sm:$0xff]  }
   0xf   : > { %1183 = vmatprep.mubr.bf16.mxu0 %v1295_v4  ;;  %1200 = vmatpush3.bf16.msra.mxu1 %v1303_v7  ;;  %v1294_v11 = vld [vmem:[%s1598_s1] sm:$0xff]   ;;  %v1296_v13 = vld [vmem:[%s1400_s21 + $0x8] sm:$0xff]   ;;  %v1298_v15 = vld [vmem:[%s1400_s21 + $0x18] sm:$0xff]  }
  0x10   : > { %1201 = vmatprep.subr.bf16.mxu1 %v1304_v8  ;;  %v1306_v12 = vld [vmem:[%s1601_s4 + $0x20] sm:$0xff]   ;;  %v1300_v17 = vld [vmem:[%s1400_s21 + $0x28] sm:$0xff]   ;;  %v1301_v18 = vld [vmem:[%s1400_s21 + $0x30] sm:$0xff]  }
  0x11   : > { %1170 = vmatpush3.bf16.msra.mxu0 %v1288_v1  ;;  %v1299_v16 = vld [vmem:[%s1400_s21 + $0x20] sm:$0xff]   ;;  %v1302_v19 = vld [vmem:[%s1400_s21 + $0x38] sm:$0xff]   ;;  %v1308_v21 = vld [vmem:[%s1601_s4 + $0x10] sm:$0xff]  }
  0x12   : > { %1171 = vmatprep.subr.bf16.mxu0 %v1289_v2  ;;  %v1307_v20 = vld [vmem:[%s1601_s4 + $0x18] sm:$0xff]   ;;  %v1309_v22 = vld [vmem:[%s1601_s4 + $0x8] sm:$0xff]   ;;  %v1310_v23 = vld [vmem:[%s1601_s4] sm:$0xff]  }
  0x13   : > { %1202 = vmatpush3.bf16.msra.mxu1 %v1304_v8  ;;  %v1311_v24 = vld [vmem:[%s1604_s7 + $0x38] sm:$0xff]   ;;  %v1312_v25 = vld [vmem:[%s1604_s7 + $0x30] sm:$0xff]   ;;  %v1458_v26 = vld [vmem:[%s1604_s7 + $0x28] sm:$0xff]  }
  0x14   : > { %1203 = vmatprep.subr.bf16.mxu1 %v1305_v10  ;;  %v1464_v27 = vld [vmem:[%s1604_s7 + $0x20] sm:$0xff]  }
  0x15   : > { %1172 = vmatpush3.bf16.msra.mxu0 %v1289_v2  ;;  %v1472_v29 = vld [vmem:[%s1599_s2] ss:$0 sm:$0xff] }
  0x16   : > { %1173 = vmatprep.subr.bf16.mxu0 %v1290_v3  ;;  %v1481_v41 = vld [vmem:[%s1600_s3] ss:$0 sm:$0xff] }
  0x17   : > { %1204 = vmatpush3.bf16.msra.mxu1 %v1305_v10 }
  0x18   : > { %1205 = vmatprep.subr.bf16.mxu1 %v1306_v12 }
  0x19   : > { %1174 = vmatpush3.bf16.msra.mxu0 %v1290_v3 }
  0x1a   : > { %1175 = vmatprep.subr.bf16.mxu0 %v1291_v5 }
  0x1b   : > { %1206 = vmatpush3.bf16.msra.mxu1 %v1306_v12 }
  0x1c   : > { %1207 = vmatprep.subr.bf16.mxu1 %v1307_v20 }
  0x1d   : > { %1176 = vmatpush3.bf16.msra.mxu0 %v1291_v5 }
  0x1e   : > { %1177 = vmatprep.subr.bf16.mxu0 %v1292_v6 }
  0x1f   : > { %1208 = vmatpush3.bf16.msra.mxu1 %v1307_v20 }
  0x20   : > { %1209 = vmatprep.subr.bf16.mxu1 %v1308_v21 }
  0x21   : > { %1178 = vmatpush3.bf16.msra.mxu0 %v1292_v6 }
  0x22   : > { %1179 = vmatprep.subr.bf16.mxu0 %v1293_v9 }
  0x23   : > { %1210 = vmatpush3.bf16.msra.mxu1 %v1308_v21 }
  0x24   : > { %1211 = vmatprep.subr.bf16.mxu1 %v1309_v22 }
  0x25   : > { %1180 = vmatpush3.bf16.msra.mxu0 %v1293_v9 }
  0x26   : > { %1181 = vmatprep.subr.bf16.mxu0 %v1294_v11 }
  0x27   : > { %1212 = vmatpush3.bf16.msra.mxu1 %v1309_v22 }
  0x28   : > { %1213 = vmatprep.subr.bf16.mxu1 %v1310_v23 }
  0x29   : > { %1182 = vmatpush3.bf16.msra.mxu0 %v1294_v11 }
  0x2a   : > { %1231 = vmatprep.subr.bf16.mxu0 %v1311_v24 }
  0x2b   : > { %1214 = vmatpush3.bf16.msra.mxu1 %v1310_v23 }
  0x2c   : > { %1184 = vmatmul.mubr.bf16.vlgmr.msra.gmra.mxu0 %v1296_v13  ;;  %1263 = vmatprep.subr.bf16.mxu1 %v1311_v24 }
  0x2d   : > { %1187 = vmatprep.mubr.bf16.mxu0 %v1297_v14  ;;  %1232 = vmatpush3.bf16.msra.mxu0 %v1311_v24 }
  0x2e   : > { %1233 = vmatprep.subr.bf16.mxu0 %v1312_v25 }
  0x31   : > { %1234 = vmatpush3.bf16.msra.mxu0 %v1312_v25 }
  0x32   : > { %1235 = vmatprep.subr.bf16.mxu0 %v1458_v26 }
  0x34   : > { %1188 = vmatmul.mubr.bf16.gmra.mxu0 %v1298_v15 }
  0x35   : > { %1191 = vmatprep.mubr.bf16.mxu0 %v1299_v16  ;;  %1236 = vmatpush3.bf16.msra.mxu0 %v1458_v26 }
  0x36   : > { %1237 = vmatprep.subr.bf16.mxu0 %v1464_v27 }
  0x39   : > { %1238 = vmatpush3.bf16.msra.mxu0 %v1464_v27 }
  0x3c   : > { %1192 = vmatmul.mubr.bf16.gmra.mxu0 %v1300_v17 }
  0x3d   : > { %1195 = vmatprep.mubr.bf16.mxu0 %v1301_v18 }
  0x44   : > { %1196 = vmatmul.mubr.bf16.gmra.mxu0 %v1302_v19 }
  0xec   : > { %v1185_v28 = vpop.f32.mrf.mxu0 }
  0xed   : > { %v516_v32 = vadd.f32 %v1185_v28, %v1472_v29 }
  0xee   : > { %v507_v30 = vpop.f32.mrf.mxu0 }
  0xef   : > { %v508_v31 = vadd.f32 %v1472_v29, %v507_v30  ;;  %v572_v39 = vmax.f32 %v516_v32, 0.0 }
  0xf0   : > { %v1186_v33 = vpop.f32.mrf.mxu0 }
  0xf1   : > { %v519_v34 = vadd.f32 %v1186_v33, %v1472_v29  ;;  %v570_v36 = vmax.f32 %v508_v31, 0.0  ;;  %v594_v48 = vadd.f32 %v1481_v41, %v572_v39  ;;  %v1316_v39 = vld [vmem:[%s1604_s7 + $0x10] sm:$0xff]  }
  0xf2   : > { %v510_v35 = vpop.f32.mrf.mxu0 }
  0xf3   : > { %v573_v37 = vmax.f32 %v519_v34, 0.0  ;;  %v511_v38 = vadd.f32 %v1472_v29, %v510_v35  ;;  %v592_v46 = vadd.f32 %v1481_v41, %v570_v36 }
  0xf4   : > { %v1189_v40 = vpop.f32.mrf.mxu0 }
  0xf5   : > { %v571_v42 = vmax.f32 %v511_v38, 0.0  ;;  %v595_v43 = vadd.f32 %v1481_v41, %v573_v37  ;;  %v532_v49 = vadd.f32 %v1189_v40, %v1472_v29  ;;  %v1317_v40 = vld [vmem:[%s1604_s7 + $0x8] sm:$0xff]  }
  0xf6   : > { %v523_v44 = vpop.f32.mrf.mxu0 }
  0xf7   : > { %v524_v45 = vadd.f32 %v1472_v29, %v523_v44  ;;  %v593_v47 = vadd.f32 %v1481_v41, %v571_v42  ;;  %v609_v54 = vpack.c.bf16 %v595_v43, %v594_v48  ;;  %v576_v58 = vmax.f32 %v532_v49, 0.0  ;;  %v1530_v43 = vld [vmem:[%s1602_s5] ss:$0 sm:$0xff] }
  0xf8   : > { %v1190_v50 = vpop.f32.mrf.mxu0 }
  0xf9   : > { %v535_v51 = vadd.f32 %v1190_v50, %v1472_v29  ;;  %v608_v52 = vpack.c.bf16 %v593_v47, %v592_v46  ;;  %v574_v55 = vmax.f32 %v524_v45, 0.0  ;;  %v598_v2 = vadd.f32 %v1481_v41, %v576_v58 }
  0xfa   : > { %v526_v53 = vpop.f32.mrf.mxu0 }
  0xfb   : > { %v577_v56 = vmax.f32 %v535_v51, 0.0  ;;  %v527_v57 = vadd.f32 %v1472_v29, %v526_v53  ;;  %1215 = vmatprep.mubr.bf16.mxu1 %v608_v52  ;;  %v596_v63 = vadd.f32 %v1481_v41, %v574_v55  ;;  %v1539_v55 = vld [vmem:[%s1603_s6] ss:$0 sm:$0xff] }
  0xfc   : > { %v1193_v59 = vpop.f32.mrf.mxu0  ;;  %1216 = vmatmul.mubr.bf16.vlgmr.msra.gmra.mxu1 %v609_v54 }
  0xfd   : > { %v575_v60 = vmax.f32 %v527_v57, 0.0  ;;  %1271 = vmatpush3.bf16.msra.mxu1 %v1311_v24  ;;  %v599_v61 = vadd.f32 %v1481_v41, %v577_v56  ;;  %v548_v3 = vadd.f32 %v1193_v59, %v1472_v29 }
  0xfe   : > { %v539_v62 = vpop.f32.mrf.mxu0  ;;  %1264 = vmatprep.subr.bf16.mxu1 %v1312_v25 }
  0xff   : > { %v597_v0 = vadd.f32 %v1481_v41, %v575_v60  ;;  %v540_v1 = vadd.f32 %v1472_v29, %v539_v62  ;;  %v611_v8 = vpack.c.bf16 %v599_v61, %v598_v2  ;;  %v580_v12 = vmax.f32 %v548_v3, 0.0 }
 0x100   : > { %v1194_v4 = vpop.f32.mrf.mxu0 }
 0x101   : > { %v551_v5 = vadd.f32 %v1194_v4, %v1472_v29  ;;  %v610_v6 = vpack.c.bf16 %v597_v0, %v596_v63  ;;  %1272 = vmatpush3.bf16.msra.mxu1 %v1312_v25  ;;  %v578_v9 = vmax.f32 %v540_v1, 0.0  ;;  %v602_v20 = vadd.f32 %v1481_v41, %v580_v12 }
 0x102   : > { %v542_v7 = vpop.f32.mrf.mxu0  ;;  %1265 = vmatprep.subr.bf16.mxu1 %v1458_v26 }
 0x103   : > { %v581_v10 = vmax.f32 %v551_v5, 0.0  ;;  %v543_v11 = vadd.f32 %v1472_v29, %v542_v7  ;;  %1219 = vmatprep.mubr.bf16.mxu1 %v610_v6  ;;  %v600_v17 = vadd.f32 %v1481_v41, %v578_v9 }
 0x104   : > { %v1197_v13 = vpop.f32.mrf.mxu0  ;;  %1220 = vmatmul.mubr.bf16.gmra.mxu1 %v611_v8 }
 0x105   : > { %v579_v14 = vmax.f32 %v543_v11, 0.0  ;;  %1273 = vmatpush3.bf16.msra.mxu1 %v1458_v26  ;;  %v603_v15 = vadd.f32 %v1481_v41, %v581_v10  ;;  %v564_v21 = vadd.f32 %v1197_v13, %v1472_v29 }
 0x106   : > { %v555_v16 = vpop.f32.mrf.mxu0  ;;  %1266 = vmatprep.subr.bf16.mxu1 %v1464_v27 }
 0x107   : > { %v601_v18 = vadd.f32 %v1481_v41, %v579_v14  ;;  %v556_v19 = vadd.f32 %v1472_v29, %v555_v16  ;;  %v613_v26 = vpack.c.bf16 %v603_v15, %v602_v20  ;;  %v584_v32 = vmax.f32 %v564_v21, 0.0 }
 0x108   : > { %v1198_v22 = vpop.f32.mrf.mxu0 }
 0x109   : > { %v567_v23 = vadd.f32 %v1198_v22, %v1472_v29  ;;  %v612_v24 = vpack.c.bf16 %v601_v18, %v600_v17  ;;  %1274 = vmatpush3.bf16.msra.mxu1 %v1464_v27  ;;  %v582_v28 = vmax.f32 %v556_v19, 0.0  ;;  %v606_v37 = vadd.f32 %v1481_v41, %v584_v32 }
 0x10a   : > { %v558_v25 = vpop.f32.mrf.mxu0 }
 0x10b   : > { %v585_v30 = vmax.f32 %v567_v23, 0.0  ;;  %v559_v31 = vadd.f32 %v1472_v29, %v558_v25  ;;  %1223 = vmatprep.mubr.bf16.mxu1 %v612_v24  ;;  %v604_v35 = vadd.f32 %v1481_v41, %v582_v28  ;;  %v1315_v29 = vld [vmem:[%s1604_s7 + $0x18] sm:$0xff]  }
 0x10c   : > { %1224 = vmatmul.mubr.bf16.gmra.mxu1 %v613_v26  ;;  %1239 = vmatprep.subr.bf16.mxu0 %v1315_v29 }
 0x10d   : > { %v583_v33 = vmax.f32 %v559_v31, 0.0  ;;  %v607_v34 = vadd.f32 %v1481_v41, %v585_v30  ;;  %1267 = vmatprep.subr.bf16.mxu1 %v1315_v29  ;;  %1240 = vmatpush3.bf16.msra.mxu0 %v1315_v29 }
 0x10e   : > { %1275 = vmatpush3.bf16.msra.mxu1 %v1315_v29  ;;  %1241 = vmatprep.subr.bf16.mxu0 %v1316_v39 }
 0x10f   : > { %v605_v36 = vadd.f32 %v1481_v41, %v583_v33  ;;  %v615_v27 = vpack.c.bf16 %v607_v34, %v606_v37  ;;  %1268 = vmatprep.subr.bf16.mxu1 %v1316_v39  ;;  %v1318_v41 = vld [vmem:[%s1604_s7] sm:$0xff]  }
 0x111   : > { %v614_v38 = vpack.c.bf16 %v605_v36, %v604_v35  ;;  %1242 = vmatpush3.bf16.msra.mxu0 %v1316_v39 }
 0x112   : > { %1276 = vmatpush3.bf16.msra.mxu1 %v1316_v39  ;;  %1243 = vmatprep.subr.bf16.mxu0 %v1317_v40 }
 0x113   : > { %1227 = vmatprep.mubr.bf16.mxu1 %v614_v38  ;;  %1269 = vmatprep.subr.bf16.mxu1 %v1317_v40 }
 0x114   : > { %1228 = vmatmul.mubr.bf16.gmra.mxu1 %v615_v27 }
 0x115   : > { %1244 = vmatpush3.bf16.msra.mxu0 %v1317_v40 }
 0x116   : > { %1277 = vmatpush3.bf16.msra.mxu1 %v1317_v40  ;;  %1245 = vmatprep.subr.bf16.mxu0 %v1318_v41 }
 0x117   : > { %1270 = vmatprep.subr.bf16.mxu1 %v1318_v41 }
 0x119   : > { %1246 = vmatpush3.bf16.msra.mxu0 %v1318_v41 }
 0x11a   : > { %1278 = vmatpush3.bf16.msra.mxu1 %v1318_v41 }
 0x1bc   : > { %v1217_v42 = vpop.f32.mrf.mxu1 }
 0x1bd   : > { %v731_v46 = vadd.f32 %v1217_v42, %v1530_v43 }
 0x1be   : > { %v722_v44 = vpop.f32.mrf.mxu1 }
 0x1bf   : > { %v723_v45 = vadd.f32 %v1530_v43, %v722_v44  ;;  %v787_v53 = vmax.f32 %v731_v46, 0.0 }
 0x1c0   : > { %v1218_v47 = vpop.f32.mrf.mxu1 }
 0x1c1   : > { %v734_v48 = vadd.f32 %v1218_v47, %v1530_v43  ;;  %v785_v50 = vmax.f32 %v723_v45, 0.0  ;;  %v809_v62 = vadd.f32 %v1539_v55, %v787_v53 }
 0x1c2   : > { %v725_v49 = vpop.f32.mrf.mxu1 }
 0x1c3   : > { %v788_v51 = vmax.f32 %v734_v48, 0.0  ;;  %v726_v52 = vadd.f32 %v1530_v43, %v725_v49  ;;  %v807_v59 = vadd.f32 %v1539_v55, %v785_v50 }
 0x1c4   : > { %v1221_v54 = vpop.f32.mrf.mxu1 }
 0x1c5   : > { %v786_v56 = vmax.f32 %v726_v52, 0.0  ;;  %v810_v57 = vadd.f32 %v1539_v55, %v788_v51  ;;  %v747_v63 = vadd.f32 %v1221_v54, %v1530_v43 }
 0x1c6   : > { %v738_v58 = vpop.f32.mrf.mxu1 }
 0x1c7   : > { %v808_v60 = vadd.f32 %v1539_v55, %v786_v56  ;;  %v739_v61 = vadd.f32 %v1530_v43, %v738_v58  ;;  %v824_v3 = vpack.c.bf16 %v810_v57, %v809_v62  ;;  %v791_v8 = vmax.f32 %v747_v63, 0.0 }
 0x1c8   : > { %v1222_v0 = vpop.f32.mrf.mxu1 }
 0x1c9   : > { %v750_v1 = vadd.f32 %v1222_v0, %v1530_v43  ;;  %v823_v2 = vpack.c.bf16 %v808_v60, %v807_v59  ;;  %v789_v5 = vmax.f32 %v739_v61, 0.0  ;;  %v813_v16 = vadd.f32 %v1539_v55, %v791_v8 }
 0x1ca   : > { %v741_v4 = vpop.f32.mrf.mxu1 }
 0x1cb   : > { %v792_v6 = vmax.f32 %v750_v1, 0.0  ;;  %v742_v7 = vadd.f32 %v1530_v43, %v741_v4  ;;  %1247 = vmatprep.mubr.bf16.mxu0 %v823_v2  ;;  %v811_v13 = vadd.f32 %v1539_v55, %v789_v5 }
 0x1cc   : > { %v1225_v9 = vpop.f32.mrf.mxu1  ;;  %1248 = vmatmul.mubr.bf16.vlgmr.msra.gmra.mxu0 %v824_v3 }
 0x1cd   : > { %v790_v10 = vmax.f32 %v742_v7, 0.0  ;;  %v814_v11 = vadd.f32 %v1539_v55, %v792_v6  ;;  %v763_v17 = vadd.f32 %v1225_v9, %v1530_v43 }
 0x1ce   : > { %v754_v12 = vpop.f32.mrf.mxu1 }
 0x1cf   : > { %v812_v14 = vadd.f32 %v1539_v55, %v790_v10  ;;  %v755_v15 = vadd.f32 %v1530_v43, %v754_v12  ;;  %v826_v22 = vpack.c.bf16 %v814_v11, %v813_v16  ;;  %v795_v26 = vmax.f32 %v763_v17, 0.0 }
 0x1d0   : > { %v1226_v18 = vpop.f32.mrf.mxu1 }
 0x1d1   : > { %v766_v19 = vadd.f32 %v1226_v18, %v1530_v43  ;;  %v825_v20 = vpack.c.bf16 %v812_v14, %v811_v13  ;;  %v793_v23 = vmax.f32 %v755_v15, 0.0  ;;  %v817_v36 = vadd.f32 %v1539_v55, %v795_v26 }
 0x1d2   : > { %v757_v21 = vpop.f32.mrf.mxu1 }
 0x1d3   : > { %v796_v24 = vmax.f32 %v766_v19, 0.0  ;;  %v758_v25 = vadd.f32 %v1530_v43, %v757_v21  ;;  %1251 = vmatprep.mubr.bf16.mxu0 %v825_v20  ;;  %v815_v33 = vadd.f32 %v1539_v55, %v793_v23 }
 0x1d4   : > { %v1229_v28 = vpop.f32.mrf.mxu1  ;;  %1252 = vmatmul.mubr.bf16.gmra.mxu0 %v826_v22 }
 0x1d5   : > { %v794_v30 = vmax.f32 %v758_v25, 0.0  ;;  %v818_v31 = vadd.f32 %v1539_v55, %v796_v24  ;;  %v779_v37 = vadd.f32 %v1229_v28, %v1530_v43 }
 0x1d6   : > { %v770_v32 = vpop.f32.mrf.mxu1 }
 0x1d7   : > { %v816_v34 = vadd.f32 %v1539_v55, %v794_v30  ;;  %v771_v35 = vadd.f32 %v1530_v43, %v770_v32  ;;  %v828_v39 = vpack.c.bf16 %v818_v31, %v817_v36  ;;  %v799_v45 = vmax.f32 %v779_v37, 0.0 }
 0x1d8   : > { %v1230_v38 = vpop.f32.mrf.mxu1 }
 0x1d9   : > { %v782_v27 = vadd.f32 %v1230_v38, %v1530_v43  ;;  %v827_v29 = vpack.c.bf16 %v816_v34, %v815_v33  ;;  %v797_v41 = vmax.f32 %v771_v35, 0.0  ;;  %v821_v50 = vadd.f32 %v1539_v55, %v799_v45 }
 0x1da   : > { %v773_v40 = vpop.f32.mrf.mxu1 }
 0x1db   : > { %v800_v42 = vmax.f32 %v782_v27, 0.0  ;;  %v774_v44 = vadd.f32 %v1530_v43, %v773_v40  ;;  %1255 = vmatprep.mubr.bf16.mxu1 %v827_v29  ;;  %v819_v48 = vadd.f32 %v1539_v55, %v797_v41  ;;  %v1108_v43 = vld [vmem:[%s1605_s8] ss:$0 sm:$0xff] }
 0x1dc   : > { %1256 = vmatmul.mubr.bf16.vlgmr.msra.gmra.mxu1 %v828_v39 }
 0x1dd   : > { %v798_v46 = vmax.f32 %v774_v44, 0.0  ;;  %v822_v47 = vadd.f32 %v1539_v55, %v800_v42 }
 0x1df   : > { %v820_v49 = vadd.f32 %v1539_v55, %v798_v46  ;;  %v830_v52 = vpack.c.bf16 %v822_v47, %v821_v50 }
 0x1e1   : > { %v829_v51 = vpack.c.bf16 %v820_v49, %v819_v48 }
 0x1e3   : > { %1259 = vmatprep.mubr.bf16.mxu1 %v829_v51 }
 0x1e4   : > { %1260 = vmatmul.mubr.bf16.gmra.mxu1 %v830_v52 }
 0x28c   : > { %v1249_v53 = vpop.f32.mrf.mxu0 }
 0x28d   : > { %v945_v54 = vadd.f32 %v1249_v53, %v1108_v43 }
 0x28e   : > { %v936_v55 = vpop.f32.mrf.mxu0 }
 0x28f   : > { %1001 = vst [vmem:[%s1576_s20 + $0x10] sm:$0xff] %v945_v54  ;;  %v937_v56 = vadd.f32 %v1108_v43, %v936_v55 }
 0x290   : > { %v1250_v57 = vpop.f32.mrf.mxu0 }
 0x291   : > { %999 = vst [vmem:[%s1576_s20] sm:$0xff] %v937_v56  ;;  %v948_v58 = vadd.f32 %v1250_v57, %v1108_v43 }
 0x292   : > { %v939_v59 = vpop.f32.mrf.mxu0 }
 0x293   : > { %1002 = vst [vmem:[%s1576_s20 + $0x18] sm:$0xff] %v948_v58  ;;  %v940_v60 = vadd.f32 %v1108_v43, %v939_v59 }
 0x294   : > { %v1253_v61 = vpop.f32.mrf.mxu0 }
 0x295   : > { %1000 = vst [vmem:[%s1576_s20 + $0x8] sm:$0xff] %v940_v60  ;;  %v961_v62 = vadd.f32 %v1253_v61, %v1108_v43 }
 0x296   : > { %v952_v63 = vpop.f32.mrf.mxu0 }
 0x297   : > { %1005 = vst [vmem:[%s1576_s20 + $0x30] sm:$0xff] %v961_v62  ;;  %v953_v0 = vadd.f32 %v1108_v43, %v952_v63 }
 0x298   : > { %v1254_v1 = vpop.f32.mrf.mxu0 }
 0x299   : > { %1003 = vst [vmem:[%s1576_s20 + $0x20] sm:$0xff] %v953_v0  ;;  %v964_v2 = vadd.f32 %v1254_v1, %v1108_v43 }
 0x29a   : > { %v955_v3 = vpop.f32.mrf.mxu0 }
 0x29b   : > { %1006 = vst [vmem:[%s1576_s20 + $0x38] sm:$0xff] %v964_v2  ;;  %v956_v4 = vadd.f32 %v1108_v43, %v955_v3 }
 0x29c   : > { %v1257_v5 = vpop.f32.mrf.mxu1 }
 0x29d   : > { %1004 = vst [vmem:[%s1576_s20 + $0x28] sm:$0xff] %v956_v4  ;;  %v977_v6 = vadd.f32 %v1257_v5, %v1108_v43 }
 0x29e   : > { %v968_v7 = vpop.f32.mrf.mxu1 }
 0x29f   : > { %1009 = vst [vmem:[%s1576_s20 + $0x50] sm:$0xff] %v977_v6  ;;  %v969_v8 = vadd.f32 %v1108_v43, %v968_v7 }
 0x2a0   : > { %v1258_v9 = vpop.f32.mrf.mxu1 }
 0x2a1   : > { %1007 = vst [vmem:[%s1576_s20 + $0x40] sm:$0xff] %v969_v8  ;;  %v980_v10 = vadd.f32 %v1258_v9, %v1108_v43 }
 0x2a2   : > { %v971_v11 = vpop.f32.mrf.mxu1 }
 0x2a3   : > { %1010 = vst [vmem:[%s1576_s20 + $0x58] sm:$0xff] %v980_v10  ;;  %v972_v12 = vadd.f32 %v1108_v43, %v971_v11 }
 0x2a4   : > { %v1261_v13 = vpop.f32.mrf.mxu1 }
 0x2a5   : > { %1008 = vst [vmem:[%s1576_s20 + $0x48] sm:$0xff] %v972_v12  ;;  %v993_v14 = vadd.f32 %v1261_v13, %v1108_v43 }
 0x2a6   : > { %v984_v15 = vpop.f32.mrf.mxu1 }
 0x2a7   : > { %1013 = vst [vmem:[%s1576_s20 + $0x70] sm:$0xff] %v993_v14  ;;  %v985_v16 = vadd.f32 %v1108_v43, %v984_v15 }
 0x2a8   : > { %v1262_v17 = vpop.f32.mrf.mxu1 }
 0x2a9   : > { %1011 = vst [vmem:[%s1576_s20 + $0x60] sm:$0xff] %v985_v16  ;;  %v996_v18 = vadd.f32 %v1262_v17, %v1108_v43 }
 0x2aa   : > { %v987_v19 = vpop.f32.mrf.mxu1 }
 0x2ab   : > { %1014 = vst [vmem:[%s1576_s20 + $0x78] sm:$0xff] %v996_v18  ;;  %v988_v20 = vadd.f32 %v1108_v43, %v987_v19 }
 0x2ad   : > { %1012 = vst [vmem:[%s1576_s20 + $0x68] sm:$0xff] %v988_v20 }
 0x2ae PF: > { %s19_s30 = sadd.s32 1, %s1325_s30  }
 0x2af   : > { %p16_p4 = scmp.ge.s32.totalorder %s19_s30, 4  }
 0x2b1   :  { %18 = sbr.rel (!%p16_p4) target bundleno = 1 (0x1), region = 86 }

</bundles_post_ra>
